<compile_context>
chip_gen: v7x
topology: tpu7x:2x2x1
jax: 0.10.0
libtpu: 0.0.40
codegen_flags: <defaults>
</compile_context>

<pallas_src>
import functools

import jax
import jax.numpy as jnp
from jax import lax
from jax.experimental import pallas as pl
from jax.experimental.pallas import tpu as pltpu

HIDDEN = 256  # fixed by the module definition


def _round_up(n, m):
    return ((n + m - 1) // m) * m


def _round_down(n, m):
    return (n // m) * m


def _vmem_capacity_bytes():
    try:
        cap = int(getattr(pltpu.get_tpu_info(), "vmem_capacity_bytes"))
        if cap > 0:
            return cap
    except Exception:
        pass
    return 64 * 1024 * 1024  # conservative: v7x per-TC VMEM


def prepare_params(params, *, compute_dtype=jnp.bfloat16):
    """One-time parameter prep (hoisted out of the per-forward path).

    * Fuses the two middle linears (no activation between them):
        W23 = w2 @ w3, b23 = b2 @ w3 + b3   (exact for forward()).
      Do NOT reuse this for extract_features — that path needs raw w2/b2.
    * Zero-pads the feature dimension of w1 / w4 / b4 to a multiple of 128 so
      the kernel's x / out tiles are lane-dense.
    * Casts MXU operands to compute_dtype; biases stay f32 (bias add / ReLU
      run in f32 on the VPU, accumulation is always f32).
    """
    hp = lax.Precision.HIGHEST
    w1, b1 = params["w1"], params["b1"]
    w2, b2 = params["w2"], params["b2"]
    w3, b3 = params["w3"], params["b3"]
    w4, b4 = params["w4"], params["b4"]

    D = w1.shape[0]
    d_pad = _round_up(D, 128)

    w23 = jnp.dot(w2, w3, precision=hp, preferred_element_type=jnp.float32)       # (256, 256)
    b23 = jnp.dot(b2, w3, precision=hp, preferred_element_type=jnp.float32) + b3  # (1, 256)

    w1p = jnp.pad(w1, ((0, d_pad - D), (0, 0))).astype(compute_dtype)   # (d_pad, 256)
    w4p = jnp.pad(w4, ((0, 0), (0, d_pad - D))).astype(compute_dtype)   # (256, d_pad)
    b4p = jnp.pad(b4, ((0, 0), (0, d_pad - D))).astype(jnp.float32)     # (1, d_pad)

    return dict(
        w1=w1p, b1=b1.astype(jnp.float32),
        w23=w23.astype(compute_dtype), b23=b23.astype(jnp.float32),
        w4=w4p, b4=b4p,
    )


def _ae_kernel(x_ref,
               w1_ref, b1_ref,      # Linear(input_dim -> 256)
               w23_ref, b23_ref,    # fused Linear(256 -> enc) . Linear(enc -> 256)
               w4_ref, b4_ref,      # Linear(256 -> input_dim)
               o_ref,
               *, compute_dtype, precision):
    mm = functools.partial(jnp.dot, preferred_element_type=jnp.float32,
                           precision=precision)

    x = x_ref[...]
    if x.dtype != compute_dtype:
        x = x.astype(compute_dtype)

    # encoder first layer + ReLU (bias add / ReLU in f32 on the VPU)
    h1 = jnp.maximum(mm(x, w1_ref[...]) + b1_ref[...], 0.0)
    # fused (encoder second layer @ decoder first layer) + ReLU
    h2 = jnp.maximum(mm(h1.astype(compute_dtype), w23_ref[...]) + b23_ref[...], 0.0)
    # decoder second layer
    out = mm(h2.astype(compute_dtype), w4_ref[...]) + b4_ref[...]
    o_ref[...] = out.astype(o_ref.dtype)


def autoencoder_forward(x, prep, *, out_dtype=None):
    """Forward pass. x: [B, input_dim]; prep: output of prepare_params()."""
    B, D = x.shape
    d_pad = prep["w1"].shape[0]
    assert d_pad >= D and d_pad % 128 == 0
    compute_dtype = prep["w1"].dtype
    out_dtype = out_dtype or x.dtype
    precision = (lax.Precision.HIGHEST if compute_dtype == jnp.float32
                 else lax.Precision.DEFAULT)

    # Feature-dim zero-pad of x only when needed (lane-dense kernel I/O).
    xp = x if d_pad == D else jnp.pad(x, ((0, 0), (0, d_pad - D)))

    in_itemsize = jnp.dtype(xp.dtype).itemsize
    out_itemsize = jnp.dtype(out_dtype).itemsize
    param_bytes = sum(int(a.size) * jnp.dtype(a.dtype).itemsize for a in prep.values())

    vmem_cap = _vmem_capacity_bytes()
    vmem_budget = int(vmem_cap * 0.7)          # headroom for compiler scratch

    # ---- batch tile: ~4 MiB of x per tile, MXU-aligned, no batch padding. ----
    target = _round_up(max(1, (4 * 1024 * 1024) // (4 * d_pad)), 256)
    target = max(256, min(target, 2048))
    if B > 256:
        # v7x has 2 TCs per chip: make sure the "parallel" batch axis splits
        # into at least two blocks.
        target = min(target, _round_up((B + 1) // 2, 256))
    block_m = B if B <= target else target     # block == full dim for small B

    def work_bytes(bm):
        return (2 * bm * d_pad * (in_itemsize + out_itemsize)  # x/out tiles, double-buffered
                + 2 * param_bytes                              # resident params (double-buffered)
                + 3 * bm * HIDDEN * 4)                         # f32 intermediates

    # Shrink the batch tile until it fits the VMEM budget (keeps 8-alignment).
    while work_bytes(block_m) > vmem_budget and block_m > 8 and block_m % 8 == 0:
        block_m = max(8, _round_down(block_m // 2, 8))
    # TODO(synk): for very large input_dim (resident params alone exceed the
    # VMEM budget), tile w1/w4 over the feature dim with an f32 accumulator
    # and pl.when init/finalize instead of shrinking block_m further; the
    # resident param specs could also use pipeline_mode=pl.Buffered(1) to
    # halve their footprint.

    grid_m = pl.cdiv(B, block_m)
    work = work_bytes(block_m)
    vmem_limit = min(max(int(work * 1.25), 32 * 1024 * 1024), int(vmem_cap))

    flops = 2 * B * (d_pad * HIDDEN + HIDDEN * HIDDEN + HIDDEN * d_pad)
    bytes_accessed = int(B * d_pad * (in_itemsize + out_itemsize) + param_bytes)
    cost = pl.CostEstimate(flops=flops, transcendentals=0,
                           bytes_accessed=bytes_accessed)

    def resident(arr):
        # Full-array block, same block index every grid step -> stays
        # VMEM-resident across the whole grid (never re-fetched).
        return pl.BlockSpec(arr.shape, lambda i: (0, 0))

    kernel = functools.partial(_ae_kernel, compute_dtype=compute_dtype,
                               precision=precision)

    out_padded = pl.pallas_call(
        kernel,
        out_shape=jax.ShapeDtypeStruct((B, d_pad), out_dtype),
        grid_spec=pltpu.PrefetchScalarGridSpec(
            num_scalar_prefetch=0,
            grid=(grid_m,),
            in_specs=[
                pl.BlockSpec((block_m, d_pad), lambda i: (i, 0)),   # x tile
                resident(prep["w1"]), resident(prep["b1"]),
                resident(prep["w23"]), resident(prep["b23"]),
                resident(prep["w4"]), resident(prep["b4"]),
            ],
            out_specs=pl.BlockSpec((block_m, d_pad), lambda i: (i, 0)),
        ),
        compiler_params=pltpu.CompilerParams(
            dimension_semantics=("parallel",),
            vmem_limit_bytes=int(vmem_limit),
        ),
        cost_estimate=cost,
    )(xp, prep["w1"], prep["b1"], prep["w23"], prep["b23"], prep["w4"], prep["b4"])

    return out_padded if d_pad == D else out_padded[:, :D]


def init_params(key, input_dim, encoding_dim):
    """Deterministic synthetic init (PyTorch-style uniform fan-in bounds)."""
    ks = jax.random.split(key, 8)

    def linear(kw, kb, fan_in, fan_out):
        bound = 1.0 / jnp.sqrt(float(fan_in))
        w = jax.random.uniform(kw, (fan_in, fan_out), jnp.float32, -bound, bound)
        b = jax.random.uniform(kb, (1, fan_out), jnp.float32, -bound, bound)
        return w, b

    w1, b1 = linear(ks[0], ks[1], input_dim, HIDDEN)
    w2, b2 = linear(ks[2], ks[3], HIDDEN, encoding_dim)
    w3, b3 = linear(ks[4], ks[5], encoding_dim, HIDDEN)
    w4, b4 = linear(ks[6], ks[7], HIDDEN, input_dim)
    return dict(w1=w1, b1=b1, w2=w2, b2=b2, w3=w3, b3=b3, w4=w4, b4=b4)


def reference_forward(x, p):
    dot = functools.partial(jnp.dot, precision=lax.Precision.HIGHEST)
    h1 = jnp.maximum(dot(x, p["w1"]) + p["b1"], 0.0)
    enc = dot(h1, p["w2"]) + p["b2"]
    h2 = jnp.maximum(dot(enc, p["w3"]) + p["b3"], 0.0)
    return dot(h2, p["w4"]) + p["b4"]


if __name__ == "__main__":
    key = jax.random.PRNGKey(0)
    k_x, k_p = jax.random.split(key)

    batch, input_dim, encoding_dim = 16, 64, 32
    x = jax.random.normal(k_x, (batch, input_dim), jnp.float32)
    params = init_params(k_p, input_dim, encoding_dim)
    ref = reference_forward(x, params)

    fwd = jax.jit(autoencoder_forward)

    # Default path: bf16 MXU operands, f32 accumulation (fast on v5e/v6e/v7x).
    prep_bf16 = prepare_params(params, compute_dtype=jnp.bfloat16)
    out_bf16 = jax.block_until_ready(fwd(x, prep_bf16))
    assert out_bf16.shape == (batch, input_dim)
    rel_err = jnp.max(jnp.abs(out_bf16 - ref)) / (jnp.max(jnp.abs(ref)) + 1e-6)
    assert rel_err < 5e-2, f"bf16 kernel rel err too large: {rel_err}"

    # f32-operand path (precision=HIGHEST): PyTorch-parity numerics.
    prep_f32 = prepare_params(params, compute_dtype=jnp.float32)
    out_f32 = jax.block_until_ready(fwd(x, prep_f32))
    assert jnp.allclose(out_f32, ref, atol=1e-3, rtol=1e-3), "f32 kernel mismatch vs reference"

    print("KERNEL_OK")
</pallas_src>

<mosaic_0001>
module attributes {stable_mosaic.version = 11 : i64} {
  func.func @_ae_kernel(%arg0: i32, %arg1: memref<16x128xf32, #tpu.memory_space<vmem>>, %arg2: memref<128x256xbf16, #tpu.memory_space<vmem>>, %arg3: memref<1x256xf32, #tpu.memory_space<vmem>>, %arg4: memref<256x256xbf16, #tpu.memory_space<vmem>>, %arg5: memref<1x256xf32, #tpu.memory_space<vmem>>, %arg6: memref<256x128xbf16, #tpu.memory_space<vmem>>, %arg7: memref<1x128xf32, #tpu.memory_space<vmem>>, %arg8: memref<16x128xf32, #tpu.memory_space<vmem>>) attributes {dimension_semantics = [#tpu.dimension_semantics<parallel>], iteration_bounds = array<i64: 1>, scalar_prefetch = 0 : i64, scratch_operands = 0 : i64, tpu.core_type = #tpu.core_type<tc>, window_params = [{transform_indices = @transform_0, window_bounds = array<i64: 16, 128>}, {pipeline_mode = #tpu.pipeline_mode<synchronous>, transform_indices = @transform_1, window_bounds = array<i64: 128, 256>}, {pipeline_mode = #tpu.pipeline_mode<synchronous>, transform_indices = @transform_2, window_bounds = array<i64: 1, 256>}, {pipeline_mode = #tpu.pipeline_mode<synchronous>, transform_indices = @transform_3, window_bounds = array<i64: 256, 256>}, {pipeline_mode = #tpu.pipeline_mode<synchronous>, transform_indices = @transform_4, window_bounds = array<i64: 1, 256>}, {pipeline_mode = #tpu.pipeline_mode<synchronous>, transform_indices = @transform_5, window_bounds = array<i64: 256, 128>}, {pipeline_mode = #tpu.pipeline_mode<synchronous>, transform_indices = @transform_6, window_bounds = array<i64: 1, 128>}, {transform_indices = @transform_7, window_bounds = array<i64: 16, 128>}]} {
    %c0 = arith.constant 0 : index
    %c0_0 = arith.constant 0 : index
    %0 = vector.load %arg1[%c0, %c0_0] : memref<16x128xf32, #tpu.memory_space<vmem>>, vector<16x128xf32>
    %1 = arith.truncf %0 : vector<16x128xf32> to vector<16x128xbf16>
    %c0_1 = arith.constant 0 : index
    %c0_2 = arith.constant 0 : index
    %2 = vector.load %arg2[%c0_1, %c0_2] : memref<128x256xbf16, #tpu.memory_space<vmem>>, vector<128x256xbf16>
    %cst = arith.constant dense<0.000000e+00> : vector<16x256xf32>
    %3 = tpu.matmul %1, %2, %cst {dimension_numbers = #tpu.dot_dimension_numbers<[1], [0], [0], [1], [0, 0, 1, 1], [], []>} : vector<16x128xbf16>, vector<128x256xbf16>, vector<16x256xf32> -> vector<16x256xf32>
    %c0_3 = arith.constant 0 : index
    %c0_4 = arith.constant 0 : index
    %4 = vector.load %arg3[%c0_3, %c0_4] : memref<1x256xf32, #tpu.memory_space<vmem>>, vector<1x256xf32>
    %5 = vector.broadcast %4 : vector<1x256xf32> to vector<16x256xf32>
    %6 = arith.addf %3, %5 : vector<16x256xf32>
    %cst_5 = arith.constant 0.000000e+00 : f32
    %7 = vector.broadcast %cst_5 : f32 to vector<16x256xf32>
    %8 = arith.maximumf %6, %7 : vector<16x256xf32>
    %9 = arith.truncf %8 : vector<16x256xf32> to vector<16x256xbf16>
    %c0_6 = arith.constant 0 : index
    %c0_7 = arith.constant 0 : index
    %10 = vector.load %arg4[%c0_6, %c0_7] : memref<256x256xbf16, #tpu.memory_space<vmem>>, vector<256x256xbf16>
    %cst_8 = arith.constant dense<0.000000e+00> : vector<16x256xf32>
    %11 = tpu.matmul %9, %10, %cst_8 {dimension_numbers = #tpu.dot_dimension_numbers<[1], [0], [0], [1], [0, 0, 1, 1], [], []>} : vector<16x256xbf16>, vector<256x256xbf16>, vector<16x256xf32> -> vector<16x256xf32>
    %c0_9 = arith.constant 0 : index
    %c0_10 = arith.constant 0 : index
    %12 = vector.load %arg5[%c0_9, %c0_10] : memref<1x256xf32, #tpu.memory_space<vmem>>, vector<1x256xf32>
    %13 = vector.broadcast %12 : vector<1x256xf32> to vector<16x256xf32>
    %14 = arith.addf %11, %13 : vector<16x256xf32>
    %cst_11 = arith.constant 0.000000e+00 : f32
    %15 = vector.broadcast %cst_11 : f32 to vector<16x256xf32>
    %16 = arith.maximumf %14, %15 : vector<16x256xf32>
    %17 = arith.truncf %16 : vector<16x256xf32> to vector<16x256xbf16>
    %c0_12 = arith.constant 0 : index
    %c0_13 = arith.constant 0 : index
    %18 = vector.load %arg6[%c0_12, %c0_13] : memref<256x128xbf16, #tpu.memory_space<vmem>>, vector<256x128xbf16>
    %cst_14 = arith.constant dense<0.000000e+00> : vector<16x128xf32>
    %19 = tpu.matmul %17, %18, %cst_14 {dimension_numbers = #tpu.dot_dimension_numbers<[1], [0], [0], [1], [0, 0, 1, 1], [], []>} : vector<16x256xbf16>, vector<256x128xbf16>, vector<16x128xf32> -> vector<16x128xf32>
    %c0_15 = arith.constant 0 : index
    %c0_16 = arith.constant 0 : index
    %20 = vector.load %arg7[%c0_15, %c0_16] : memref<1x128xf32, #tpu.memory_space<vmem>>, vector<1x128xf32>
    %21 = vector.broadcast %20 : vector<1x128xf32> to vector<16x128xf32>
    %22 = arith.addf %19, %21 : vector<16x128xf32>
    %c0_17 = arith.constant 0 : index
    %c0_18 = arith.constant 0 : index
    %23 = vector.load %arg8[%c0_17, %c0_18] : memref<16x128xf32, #tpu.memory_space<vmem>>, vector<16x128xf32>
    tpu.vector_store %arg8[%c0_17, %c0_18], %22 {strides = array<i32>} : memref<16x128xf32, #tpu.memory_space<vmem>>, vector<16x128xf32>,
    return
  }
  func.func @transform_0(%arg0: i32) -> (i32, i32) {
    %c0_i32 = arith.constant 0 : i32
    %c0_i32_0 = arith.constant 0 : i32
    return %arg0, %c0_i32 : i32, i32
  }
  func.func @transform_1(%arg0: i32) -> (i32, i32) {
    %c0_i32 = arith.constant 0 : i32
    %c0_i32_0 = arith.constant 0 : i32
    %c0_i32_1 = arith.constant 0 : i32
    return %c0_i32, %c0_i32_0 : i32, i32
  }
  func.func @transform_2(%arg0: i32) -> (i32, i32) {
    %c0_i32 = arith.constant 0 : i32
    %c0_i32_0 = arith.constant 0 : i32
    %c0_i32_1 = arith.constant 0 : i32
    return %c0_i32, %c0_i32_0 : i32, i32
  }
  func.func @transform_3(%arg0: i32) -> (i32, i32) {
    %c0_i32 = arith.constant 0 : i32
    %c0_i32_0 = arith.constant 0 : i32
    %c0_i32_1 = arith.constant 0 : i32
    return %c0_i32, %c0_i32_0 : i32, i32
  }
  func.func @transform_4(%arg0: i32) -> (i32, i32) {
    %c0_i32 = arith.constant 0 : i32
    %c0_i32_0 = arith.constant 0 : i32
    %c0_i32_1 = arith.constant 0 : i32
    return %c0_i32, %c0_i32_0 : i32, i32
  }
  func.func @transform_5(%arg0: i32) -> (i32, i32) {
    %c0_i32 = arith.constant 0 : i32
    %c0_i32_0 = arith.constant 0 : i32
    %c0_i32_1 = arith.constant 0 : i32
    return %c0_i32, %c0_i32_0 : i32, i32
  }
  func.func @transform_6(%arg0: i32) -> (i32, i32) {
    %c0_i32 = arith.constant 0 : i32
    %c0_i32_0 = arith.constant 0 : i32
    %c0_i32_1 = arith.constant 0 : i32
    return %c0_i32, %c0_i32_0 : i32, i32
  }
  func.func @transform_7(%arg0: i32) -> (i32, i32) {
    %c0_i32 = arith.constant 0 : i32
    %c0_i32_0 = arith.constant 0 : i32
    return %arg0, %c0_i32 : i32, i32
  }
}

</mosaic_0001>

<bundles_post_ra>
// kernel: autoencoder_forward.1
= control target key start
LH: loop header
LB: loop body
LE: loop exit
PB: predicated region body
PF: predicated region fallthrough
CT: control target
= control target key end

     0   :  { %12 = vsyncpa [#allocation3], 0  ;;  %s1084_s0 = inlined_call_operand.vmem [shape: f32[16,128], index: 0, kind: input, shape index: {}]   ;;  %s1085_s1 = inlined_call_operand.hbm [shape: bf16[128,256], index: 1, kind: input, shape index: {}]   ;;  %s1086_s2 = inlined_call_operand.vmem [shape: f32[1,256], index: 2, kind: input, shape index: {}]   ;;  %s1087_s3 = inlined_call_operand.hbm [shape: bf16[256,256], index: 3, kind: input, shape index: {}]   ;;  %s1088_s4 = inlined_call_operand.vmem [shape: f32[1,256], index: 4, kind: input, shape index: {}]   ;;  %s1089_s5 = inlined_call_operand.hbm [shape: bf16[256,128], index: 5, kind: input, shape index: {}]   ;;  %s1090_s6 = inlined_call_operand.vmem [shape: f32[1,128], index: 6, kind: input, shape index: {}]   ;;  %s1091_s7 = inlined_call_operand.hbm [shape: f32[16,128], index: 7, kind: output, shape index: {}]  }
   0x1   :  { %13 = vsyncpa [#allocation6], 0 }
   0x2   :  { %14 = vsyncpa [#allocation4], 0  ;;  %s956_s24 = smov [#allocation5]   ;;  %s957_s26 = smov [#allocation2]  }
   0x3   :  { %s36_s25 = sshll.u32 %s956_s24, 4  ;;  %s22_s27 = sshll.u32 %s957_s26, 4  ;;  %s37_s25 = int_to_ptr.vmem [resolvable:$true] %s36_s25  ;;  %s1005_s27 = int_to_ptr.vmem [resolvable:$true] %s22_s27 }
   0x4   :  { %s862_s30 = scalar_lea.hbm %s1087_s3, 4096 }
   0x5   :  { %p863_p0 = scmp.ne.s32.totalorder %s1087_s3, %s862_s30  ;;  %p866_p1 = scmp.lt.u32.totalorder %s862_s30, %s1087_s3 }
   0x7   :  { %p868_p2 = pnand %p866_p1, %p863_p0 }
   0x9   :  { %871 = shalt.err (!%p868_p2)
}
   0xa   :  { %s872_s12 = scalar_lea.vmem %s37_s25, 4096  ;;  %p877_p4 = scmp.lt.s32.totalorder %s37_s25, %s37_s25 }
   0xb   :  { %p873_p3 = scmp.ne.s32.totalorder %s37_s25, %s872_s12  ;;  %p878_p5 = scmp.lt.s32.totalorder %s872_s12, %s872_s12 }
   0xd   :  { %p879_p6 = por %p878_p5, %p877_p4 }
   0xf   :  { %p880_p7 = pnand %p879_p6, %p873_p3 }
  0x11   :  { %883 = shalt.err (!%p880_p7)
}
  0x12   :  { %s958_s13 = smov 128   ;;  %s959_s14 = smov 8  }
  0x13   :  { %42 = dma.hbm_to_vmem [thread:$0]  %s1087_s3, 4096, %s37_s25, [#allocation6], %s958_s13, %s958_s13, %s959_s14  }
  0x14   :  { %s884_s19 = scalar_lea.hbm %s1085_s1, 2048 }
  0x15   :  { %p885_p8 = scmp.ne.s32.totalorder %s1085_s1, %s884_s19  ;;  %p888_p9 = scmp.lt.u32.totalorder %s884_s19, %s1085_s1 }
  0x17   :  { %p890_p10 = pnand %p888_p9, %p885_p8 }
  0x19   :  { %893 = shalt.err (!%p890_p10)
}
  0x1a   :  { %s894_s24 = scalar_lea.vmem %s1005_s27, 2048  ;;  %p899_p12 = scmp.lt.s32.totalorder %s1005_s27, %s1005_s27 }
  0x1b   :  { %p895_p11 = scmp.ne.s32.totalorder %s1005_s27, %s894_s24  ;;  %p900_p13 = scmp.lt.s32.totalorder %s894_s24, %s894_s24 }
  0x1d   :  { %p901_p0 = por %p900_p13, %p899_p12 }
  0x1f   :  { %p902_p1 = pnand %p901_p0, %p895_p11 }
  0x21   :  { %905 = shalt.err (!%p902_p1)
}
  0x22   :  { %28 = dma.hbm_to_vmem [thread:$0]  %s1085_s1, 2048, %s1005_s27, [#allocation3], %s958_s13, %s958_s13, %s959_s14  }
  0x23   :  { %s960_s26 = smov [#allocation7]   ;;  %s906_s8 = scalar_lea.hbm %s1089_s5, 2048 }
  0x24   :  { %s50_s28 = sshll.u32 %s960_s26, 4  ;;  %p907_p2 = scmp.ne.s32.totalorder %s1089_s5, %s906_s8  ;;  %s51_s28 = int_to_ptr.vmem [resolvable:$true] %s50_s28 }
  0x25   :  { %p910_p3 = scmp.lt.u32.totalorder %s906_s8, %s1089_s5 }
  0x27   :  { %p912_p4 = pnand %p910_p3, %p907_p2 }
  0x29   :  { %915 = shalt.err (!%p912_p4)
}
  0x2a   :  { %s916_s15 = scalar_lea.vmem %s51_s28, 2048  ;;  %p921_p6 = scmp.lt.s32.totalorder %s51_s28, %s51_s28 }
  0x2b   :  { %p917_p5 = scmp.ne.s32.totalorder %s51_s28, %s916_s15  ;;  %p922_p7 = scmp.lt.s32.totalorder %s916_s15, %s916_s15 }
  0x2d   :  { %p923_p8 = por %p922_p7, %p921_p6 }
  0x2f   :  { %p924_p9 = pnand %p923_p8, %p917_p5 }
  0x31   :  { %927 = shalt.err (!%p924_p9)
}
  0x32   :  { %s961_s1 = smov 64   ;;  %s962_s27 = smov 4  }
  0x33   :  { %56 = dma.hbm_to_vmem [thread:$0]  %s1089_s5, 2048, %s51_s28, [#allocation6], %s961_s1, %s961_s1, %s962_s27  }
  0x34   :  { %950 = dma.done.wait [#allocation3], 2048  }
  0x35   :  { %951 = vsyncadd [#allocation3], 4294965248 }
  0x36   :  { %952 = dma.done.wait [#allocation6], 6144  }
  0x37   :  { %953 = vsyncadd [#allocation6], 4294961152  ;;  %v963_v0 = vmov 0   ;;  %v774_v1 = vld [vmem:[#allocation2 + $0x4] ss:$8 sps:$4 sm:$0xff]   ;;  %v850_v56 = vld [vmem:[#allocation7 + $0x50] sm:$0xff]   ;;  %v90_v63 = vlaneseq }
  0x38   :  { %212 = vmatprep.mubr.bf16.mxu0 %v963_v0  ;;  %v776_v2 = vld [vmem:[#allocation2] ss:$8 sps:$4 sm:$0xff]   ;;  %180 = vmatprep.subr.bf16.mxu0 %v774_v1  ;;  %v777_v3 = vld [vmem:[#allocation2 + $0x14] ss:$8 sps:$4 sm:$0xff]   ;;  %v779_v4 = vld [vmem:[#allocation2 + $0x10] ss:$8 sps:$4 sm:$0xff]  }
  0x39   :  { %181 = vmatpush1.bf16.msra.mxu0 %v776_v2  ;;  %v780_v5 = vld [vmem:[#allocation2 + $0x24] ss:$8 sps:$4 sm:$0xff]   ;;  %v782_v6 = vld [vmem:[#allocation2 + $0x20] ss:$8 sps:$4 sm:$0xff]   ;;  %v783_v7 = vld [vmem:[#allocation2 + $0x34] ss:$8 sps:$4 sm:$0xff]  }
  0x3a   :  { %182 = vmatprep.subr.bf16.mxu0 %v777_v3  ;;  %v785_v8 = vld [vmem:[#allocation2 + $0x30] ss:$8 sps:$4 sm:$0xff]   ;;  %v786_v9 = vld [vmem:[#allocation2 + $0x44] ss:$8 sps:$4 sm:$0xff]   ;;  %v800_v11 = vld [vmem:[#allocation5] ss:$8 sps:$4 sm:$0xff]  }
  0x3b   :  { %v798_v10 = vld [vmem:[#allocation5 + $0x4] ss:$8 sps:$4 sm:$0xff]   ;;  %v801_v12 = vld [vmem:[#allocation5 + $0x14] ss:$8 sps:$4 sm:$0xff]   ;;  %v788_v13 = vld [vmem:[#allocation2 + $0x40] ss:$8 sps:$4 sm:$0xff]  }
  0x3c   :  { %433 = vmatprep.subr.bf16.mxu1 %v798_v10  ;;  %v803_v14 = vld [vmem:[#allocation5 + $0x10] ss:$8 sps:$4 sm:$0xff]   ;;  %v789_v15 = vld [vmem:[#allocation2 + $0x54] ss:$8 sps:$4 sm:$0xff]   ;;  %v804_v16 = vld [vmem:[#allocation5 + $0x24] ss:$8 sps:$4 sm:$0xff]  }
  0x3d   :  { %183 = vmatpush1.bf16.msra.mxu0 %v779_v4  ;;  %434 = vmatpush1.bf16.msra.mxu1 %v800_v11  ;;  %v791_v17 = vld [vmem:[#allocation2 + $0x50] ss:$8 sps:$4 sm:$0xff]   ;;  %v806_v18 = vld [vmem:[#allocation5 + $0x20] ss:$8 sps:$4 sm:$0xff]   ;;  %v792_v19 = vld [vmem:[#allocation2 + $0x64] ss:$8 sps:$4 sm:$0xff]  }
  0x3e   :  { %184 = vmatprep.subr.bf16.mxu0 %v780_v5  ;;  %435 = vmatprep.subr.bf16.mxu1 %v801_v12  ;;  %v807_v20 = vld [vmem:[#allocation5 + $0x34] ss:$8 sps:$4 sm:$0xff]   ;;  %v794_v21 = vld [vmem:[#allocation2 + $0x60] ss:$8 sps:$4 sm:$0xff]   ;;  %v809_v22 = vld [vmem:[#allocation5 + $0x30] ss:$8 sps:$4 sm:$0xff]  }
  0x3f   :  { %v795_v23 = vld [vmem:[#allocation2 + $0x74] ss:$8 sps:$4 sm:$0xff]   ;;  %v810_v24 = vld [vmem:[#allocation5 + $0x44] ss:$8 sps:$4 sm:$0xff]   ;;  %v797_v25 = vld [vmem:[#allocation2 + $0x70] ss:$8 sps:$4 sm:$0xff]  }
  0x40   :  { %v69_v26 = vld [vmem:[%s1084_s0] sm:$0xff]  ;;  %v70_v27 = vld [vmem:[%s1084_s0 + $0x8] sm:$0xff]  ;;  %v813_v29 = vld [vmem:[#allocation5 + $0x54] ss:$8 sps:$4 sm:$0xff]   ;;  %v91_v0 = vshrl.u32 %v90_v63, 7  ;;  %s964_s24 = smov [#allocation8]  }
  0x41   :  { %185 = vmatpush1.bf16.msra.mxu0 %v782_v6  ;;  %436 = vmatpush1.bf16.msra.mxu1 %v803_v14  ;;  %v812_v28 = vld [vmem:[#allocation5 + $0x40] ss:$8 sps:$4 sm:$0xff]   ;;  %v815_v30 = vld [vmem:[#allocation5 + $0x50] ss:$8 sps:$4 sm:$0xff]   ;;  %v71_v31 = vpack.c.bf16 %v70_v27, %v69_v26  ;;  %v816_v32 = vld [vmem:[#allocation5 + $0x64] ss:$8 sps:$4 sm:$0xff]  }
  0x42   :  { %186 = vmatprep.subr.bf16.mxu0 %v783_v7  ;;  %437 = vmatprep.subr.bf16.mxu1 %v804_v16  ;;  %v818_v33 = vld [vmem:[#allocation5 + $0x60] ss:$8 sps:$4 sm:$0xff]   ;;  %v819_v34 = vld [vmem:[#allocation5 + $0x74] ss:$8 sps:$4 sm:$0xff]   ;;  %v821_v35 = vld [vmem:[#allocation5 + $0x70] ss:$8 sps:$4 sm:$0xff]  }
  0x43   :  { %v822_v36 = vld [vmem:[#allocation5 + $0x84] ss:$8 sps:$4 sm:$0xff]   ;;  %v824_v37 = vld [vmem:[#allocation5 + $0x80] ss:$8 sps:$4 sm:$0xff]   ;;  %v825_v38 = vld [vmem:[#allocation5 + $0x94] ss:$8 sps:$4 sm:$0xff]  }
  0x44   :  { %v827_v39 = vld [vmem:[#allocation5 + $0x90] ss:$8 sps:$4 sm:$0xff]   ;;  %v828_v40 = vld [vmem:[#allocation5 + $0xa4] ss:$8 sps:$4 sm:$0xff]   ;;  %v830_v41 = vld [vmem:[#allocation5 + $0xa0] ss:$8 sps:$4 sm:$0xff]  }
  0x45   :  { %187 = vmatpush1.bf16.msra.mxu0 %v785_v8  ;;  %438 = vmatpush1.bf16.msra.mxu1 %v806_v18  ;;  %v831_v42 = vld [vmem:[#allocation5 + $0xb4] ss:$8 sps:$4 sm:$0xff]   ;;  %v833_v43 = vld [vmem:[#allocation5 + $0xb0] ss:$8 sps:$4 sm:$0xff]   ;;  %v834_v44 = vld [vmem:[#allocation5 + $0xc4] ss:$8 sps:$4 sm:$0xff]  }
  0x46   :  { %188 = vmatprep.subr.bf16.mxu0 %v786_v9  ;;  %439 = vmatprep.subr.bf16.mxu1 %v807_v20  ;;  %v836_v45 = vld [vmem:[#allocation5 + $0xc0] ss:$8 sps:$4 sm:$0xff]   ;;  %v837_v46 = vld [vmem:[#allocation5 + $0xd4] ss:$8 sps:$4 sm:$0xff]   ;;  %v839_v47 = vld [vmem:[#allocation5 + $0xd0] ss:$8 sps:$4 sm:$0xff]  }
  0x47   :  { %v840_v48 = vld [vmem:[#allocation5 + $0xe4] ss:$8 sps:$4 sm:$0xff]   ;;  %v842_v49 = vld [vmem:[#allocation5 + $0xe0] ss:$8 sps:$4 sm:$0xff]   ;;  %v843_v50 = vld [vmem:[#allocation5 + $0xf4] ss:$8 sps:$4 sm:$0xff]  }
  0x48   :  { %v845_v51 = vld [vmem:[#allocation5 + $0xf0] ss:$8 sps:$4 sm:$0xff]   ;;  %v846_v52 = vld [vmem:[#allocation7 + $0x40] sm:$0xff]   ;;  %v848_v54 = vld [vmem:[#allocation7 + $0x48] sm:$0xff]   ;;  %v92_v1 = vsub.s32 0, %v91_v0  ;;  %v96_v3 = vsub.s32 1, %v91_v0 }
  0x49   :  { %189 = vmatpush1.bf16.msra.mxu0 %v788_v13  ;;  %440 = vmatpush1.bf16.msra.mxu1 %v809_v22  ;;  %v847_v53 = vld [vmem:[#allocation7] sm:$0xff]   ;;  %v849_v55 = vld [vmem:[#allocation7 + $0x8] sm:$0xff]   ;;  %v851_v57 = vld [vmem:[#allocation7 + $0x10] sm:$0xff]   ;;  %s665_s3 = sshll.u32 %s964_s24, 4  ;;  %s666_s3 = int_to_ptr.vmem [resolvable:$true] %s665_s3 }
  0x4a   :  { %190 = vmatprep.subr.bf16.mxu0 %v789_v15  ;;  %441 = vmatprep.subr.bf16.mxu1 %v810_v24  ;;  %v852_v58 = vld [vmem:[#allocation7 + $0x58] sm:$0xff]   ;;  %v854_v60 = vld [vmem:[#allocation7 + $0x60] sm:$0xff]   ;;  %v856_v62 = vld [vmem:[#allocation7 + $0x68] sm:$0xff]   ;;  %s928_s25 = scalar_lea.vmem %s666_s3, 256  ;;  %p933_p11 = scmp.lt.s32.totalorder %s666_s3, %s666_s3 }
  0x4b   :  { %v853_v59 = vld [vmem:[#allocation7 + $0x18] sm:$0xff]   ;;  %v855_v61 = vld [vmem:[#allocation7 + $0x20] sm:$0xff]   ;;  %v857_v20 = vld [vmem:[#allocation7 + $0x28] sm:$0xff]   ;;  %p929_p10 = scmp.ne.s32.totalorder %s666_s3, %s928_s25  ;;  %p934_p12 = scmp.lt.s32.totalorder %s928_s25, %s928_s25 }
  0x4c   :  { %v88_v2 = vld [vmem:[%s1086_s2] sm:$0x3]  ;;  %v859_v22 = vld [vmem:[#allocation7 + $0x30] sm:$0xff]   ;;  %v861_v24 = vld [vmem:[#allocation7 + $0x38] sm:$0xff]  }
  0x4d   :  { %191 = vmatpush1.bf16.msra.mxu0 %v791_v17  ;;  %442 = vmatpush1.bf16.msra.mxu1 %v812_v28  ;;  %v93_v4 = vrot.slane %v88_v2, %v92_v1  ;;  %v97_v5 = vrot.slane %v88_v2, %v96_v3  ;;  %p935_p13 = por %p934_p12, %p933_p11 }
  0x4e   :  { %192 = vmatprep.subr.bf16.mxu0 %v792_v19  ;;  %443 = vmatprep.subr.bf16.mxu1 %v813_v29 }
  0x4f   :  { %p936_p0 = pnand %p935_p13, %p929_p10 }
  0x51   :  { %193 = vmatpush1.bf16.msra.mxu0 %v794_v21  ;;  %444 = vmatpush1.bf16.msra.mxu1 %v815_v30  ;;  %v858_v21 = vld [vmem:[#allocation7 + $0x70] sm:$0xff]  }
  0x52   :  { %194 = vmatprep.subr.bf16.mxu0 %v795_v23  ;;  %445 = vmatprep.subr.bf16.mxu1 %v816_v32  ;;  %v860_v23 = vld [vmem:[#allocation7 + $0x78] sm:$0xff]  }
  0x55   :  { %195 = vmatpush1.bf16.msra.mxu0 %v797_v25  ;;  %446 = vmatpush1.bf16.msra.mxu1 %v818_v33  ;;  %v261_v25 = vld [vmem:[%s1088_s4] sm:$0x3] }
  0x56   :  { %447 = vmatprep.subr.bf16.mxu1 %v819_v34  ;;  %743 = vmatprep.subr.bf16.mxu0 %v846_v52  ;;  %v266_v26 = vrot.slane %v261_v25, %v92_v1  ;;  %v270_v27 = vrot.slane %v261_v25, %v96_v3 }
  0x58   :  { %213 = vmatmul.mubr.bf16.vlgmr.msra.gmra.mrb[0].mxu0 %v71_v31 }
  0x59   :  { %448 = vmatpush1.bf16.msra.mxu1 %v821_v35  ;;  %744 = vmatpush3.bf16.msra.mxu0 %v847_v53 }
  0x5a   :  { %449 = vmatprep.subr.bf16.mxu1 %v822_v36  ;;  %745 = vmatprep.subr.bf16.mxu0 %v848_v54 }
  0x5d   :  { %450 = vmatpush1.bf16.msra.mxu1 %v824_v37  ;;  %746 = vmatpush3.bf16.msra.mxu0 %v849_v55 }
  0x5e   :  { %451 = vmatprep.subr.bf16.mxu1 %v825_v38  ;;  %747 = vmatprep.subr.bf16.mxu0 %v850_v56 }
  0x61   :  { %452 = vmatpush1.bf16.msra.mxu1 %v827_v39  ;;  %748 = vmatpush3.bf16.msra.mxu0 %v851_v57 }
  0x62   :  { %453 = vmatprep.subr.bf16.mxu1 %v828_v40  ;;  %749 = vmatprep.subr.bf16.mxu0 %v852_v58 }
  0x65   :  { %454 = vmatpush1.bf16.msra.mxu1 %v830_v41  ;;  %750 = vmatpush3.bf16.msra.mxu0 %v853_v59 }
  0x66   :  { %455 = vmatprep.subr.bf16.mxu1 %v831_v42  ;;  %751 = vmatprep.subr.bf16.mxu0 %v854_v60 }
  0x69   :  { %456 = vmatpush1.bf16.msra.mxu1 %v833_v43  ;;  %752 = vmatpush3.bf16.msra.mxu0 %v855_v61  ;;  %v726_v43 = vld [vmem:[%s1090_s6] ss:$0 sm:$0xff] }
  0x6a   :  { %457 = vmatprep.subr.bf16.mxu1 %v834_v44  ;;  %753 = vmatprep.subr.bf16.mxu0 %v856_v62 }
  0x6d   :  { %458 = vmatpush1.bf16.msra.mxu1 %v836_v45  ;;  %754 = vmatpush3.bf16.msra.mxu0 %v857_v20 }
  0x6e   :  { %459 = vmatprep.subr.bf16.mxu1 %v837_v46  ;;  %755 = vmatprep.subr.bf16.mxu0 %v858_v21 }
  0x71   :  { %460 = vmatpush1.bf16.msra.mxu1 %v839_v47  ;;  %756 = vmatpush3.bf16.msra.mxu0 %v859_v22 }
  0x72   :  { %461 = vmatprep.subr.bf16.mxu1 %v840_v48  ;;  %757 = vmatprep.subr.bf16.mxu0 %v860_v23 }
  0x75   :  { %462 = vmatpush1.bf16.msra.mxu1 %v842_v49  ;;  %758 = vmatpush3.bf16.msra.mxu0 %v861_v24 }
  0x76   :  { %463 = vmatprep.subr.bf16.mxu1 %v843_v50 }
  0x79   :  { %464 = vmatpush1.bf16.msra.mxu1 %v845_v51 }
 0x12b   :  { %v214_v6 = vpop.f32.mrb[0].mxu0 }
 0x12c   :  { %v215_v7 = vadd.f32 %v214_v6, %v93_v4  ;;  %v216_v8 = vpop.f32.mrb[1].mxu0 }
 0x12d   :  { %v217_v9 = vadd.f32 %v216_v8, %v97_v5  ;;  %v218_v10 = vpop.f32.mrb[2].mxu0 }
 0x12e   :  { %v219_v11 = vadd.f32 %v218_v10, %v93_v4  ;;  %v220_v12 = vpop.f32.mrb[3].mxu0  ;;  %v223_v14 = vmax.f32 %v215_v7, 0.0 }
 0x12f   :  { %v221_v13 = vadd.f32 %v220_v12, %v97_v5  ;;  %v224_v16 = vmax.f32 %v217_v9, 0.0 }
 0x130   :  { %v225_v15 = vmax.f32 %v219_v11, 0.0 }
 0x131   :  { %v226_v17 = vmax.f32 %v221_v13, 0.0 }
 0x132   :  { %v227_v18 = vpack.c.bf16 %v225_v15, %v223_v14 }
 0x133   :  { %v228_v19 = vpack.c.bf16 %v226_v17, %v224_v16 }
 0x135   :  { %465 = vmatprep.mubr.bf16.mxu1 %v228_v19 }
 0x136   :  { %466 = vmatmul.mubr.bf16.vlgmr.msra.gmra.mrb[0].mxu1 %v227_v18 }
 0x209   :  { %v467_v28 = vpop.f32.mrb[0].mxu1 }
 0x20a   :  { %v468_v29 = vadd.f32 %v467_v28, %v266_v26  ;;  %v469_v30 = vpop.f32.mrb[1].mxu1 }
 0x20b   :  { %v470_v31 = vadd.f32 %v469_v30, %v270_v27  ;;  %v471_v32 = vpop.f32.mrb[2].mxu1 }
 0x20c   :  { %v472_v33 = vadd.f32 %v471_v32, %v266_v26  ;;  %v473_v34 = vpop.f32.mrb[3].mxu1  ;;  %v476_v36 = vmax.f32 %v468_v29, 0.0 }
 0x20d   :  { %v474_v35 = vadd.f32 %v473_v34, %v270_v27  ;;  %v477_v38 = vmax.f32 %v470_v31, 0.0 }
 0x20e   :  { %v478_v37 = vmax.f32 %v472_v33, 0.0 }
 0x20f   :  { %v479_v39 = vmax.f32 %v474_v35, 0.0 }
 0x210   :  { %v480_v40 = vpack.c.bf16 %v478_v37, %v476_v36 }
 0x211   :  { %v481_v41 = vpack.c.bf16 %v479_v39, %v477_v38 }
 0x213   :  { %649 = vmatprep.mubr.bf16.mxu0 %v481_v41 }
 0x214   :  { %650 = vmatmul.mubr.bf16.vlgmr.msra.gmra.mrb[4].mxu0 %v480_v40 }
 0x2e7   :  { %v759_v42 = vpop.f32.mrb[4].mxu0 }
 0x2e8   :  { %v760_v44 = vpop.f32.mrb[5].mxu0 }
 0x2e9   :  { %v761_v45 = vadd.f32 %v760_v44, %v759_v42  ;;  %v762_v46 = vpop.f32.mrb[6].mxu0 }
 0x2ea   :  { %v763_v47 = vpop.f32.mrb[7].mxu0 }
 0x2eb   :  { %v652_v48 = vadd.f32 %v761_v45, %v726_v43  ;;  %v764_v49 = vadd.f32 %v763_v47, %v762_v46 }
 0x2ed   :  { %658 = vst [vmem:[#allocation8] sm:$0xff] %v652_v48  ;;  %v655_v50 = vadd.f32 %v764_v49, %v726_v43 }
 0x2ef   :  { %659 = vst [vmem:[#allocation8 + $0x8] sm:$0xff] %v655_v50 }
 0x2f0   :  { %939 = shalt.err (!%p936_p0)
}
 0x2f1   :  { %s940_s28 = scalar_lea.hbm %s1091_s7, 256 }
 0x2f2   :  { %p941_p1 = scmp.ne.s32.totalorder %s1091_s7, %s940_s28  ;;  %p944_p2 = scmp.lt.u32.totalorder %s940_s28, %s1091_s7 }
 0x2f4   :  { %p946_p3 = pnand %p944_p2, %p941_p1 }
 0x2f6   :  { %949 = shalt.err (!%p946_p3)
}
 0x2f7   :  { %671 = dma.vmem_to_hbm [thread:$0]  %s666_s3, 256, %s1091_s7, [#allocation4], %s958_s13, %s958_s13, %s959_s14  }
 0x2f8   :  { %954 = dma.done.wait [#allocation4], 256  }
 0x2f9   :  { %955 = vsyncadd [#allocation4], 4294967040 }
 0x2fa   :  { %675 = vsyncpa [#allocation3], 1 }
 0x2fb   :  { %676 = vsyncpa [#allocation6], 1 }
 0x2fc   :  { %677 = vsyncpa [#allocation4], 1 }

</bundles_post_ra>
